<compile_context>
chip_gen: v6e
topology: v6e:2x2x1
jax: 0.10.0
libtpu: 0.0.40
codegen_flags: <defaults>
</compile_context>

<pallas_src>
import math
from functools import partial

import jax
import jax.numpy as jnp
from jax.experimental import pallas as pl
from jax.experimental.pallas import tpu as pltpu

CMAX = 8          # every layer's channel count zero-padded to this (8-sublane dense)
KSIZE = 3
NUM_LAYERS = 8    # ae1.fw, c0.fw, c1.fw, c2.fw, c2.bw, c1.bw, c0.bw, ae1.bw


# ---------------------------------------------------------------------------
# pltpu.roll convention probe.
# We need shifted[:, m] == act[:, (m + delta) % HW]. Under jnp.roll semantics
# that is roll(act, -delta). The one-off probe (cached) guards against the
# opposite rotation convention so tap extraction is correct by construction.
# NOTE: the probe runs eagerly; call the wrapper outside jit the first time.
# ---------------------------------------------------------------------------
_ROLL_MATCHES_JNP = None


def _roll_matches_jnp_roll():
    global _ROLL_MATCHES_JNP
    if _ROLL_MATCHES_JNP is None:
        def probe_kernel(x_ref, o_ref):
            o_ref[...] = pltpu.roll(x_ref[...], 1, axis=1)

        x = jnp.broadcast_to(jnp.arange(128, dtype=jnp.float32), (8, 128))
        y = pl.pallas_call(
            probe_kernel,
            out_shape=jax.ShapeDtypeStruct((8, 128), jnp.float32),
        )(x)
        # jnp.roll(x, 1, axis=1)[0, 0] == 127
        _ROLL_MATCHES_JNP = bool(jax.device_get(y)[0, 0] == 127.0)
    return _ROLL_MATCHES_JNP


# ------------------------------- fused kernel -------------------------------

def _daes_fused_kernel(x_ref, w_ref, b_ref,
                       a1_ref, a2_ref, a3_ref, a4_ref, xr_ref,
                       *, H, W, roll_sign):
    """One grid step = one image; chains all 8 conv+sigmoid layers in VMEM.

    x_ref : (1, CMAX, H*W) bf16    w_ref : (L, 9, CMAX, CMAX) bf16
    b_ref : (L, CMAX, 1)  f32      outputs: (1, CMAX, H*W) f32
    """
    HW = H * W
    cmax = x_ref.shape[1]

    # (h, w) coordinate of every lane; the 9 tap masks are identical for all
    # layers (same spatial size), so build them once and reuse.
    col = jax.lax.broadcasted_iota(jnp.int32, (1, HW), 1)
    hh = col // W
    ww = col % W

    taps = []  # (tap_index, delta, roll_shift, validity_mask)
    for kh in range(KSIZE):
        for kw in range(KSIZE):
            dh, dw = kh - 1, kw - 1
            delta = dh * W + dw                      # flat source-pixel offset
            shift = (roll_sign * delta) % HW         # non-negative roll amount
            valid = ((hh + dh >= 0) & (hh + dh < H) &
                     (ww + dw >= 0) & (ww + dw < W))
            taps.append((kh * KSIZE + kw, delta, shift, valid))

    def conv3x3_sigmoid(act, layer):
        # act: (CMAX, HW) f32.  out[co, m] = sigmoid(b[co] + sum_taps W_tap @ shifted(act))
        acc = jnp.zeros((cmax, HW), jnp.float32)
        for t, delta, shift, valid in taps:
            if delta == 0:
                tapped = act.astype(jnp.bfloat16)
            else:
                shifted = pltpu.roll(act, shift, axis=1)          # XLU lane rotate
                tapped = jnp.where(valid, shifted, 0.0).astype(jnp.bfloat16)
            acc = acc + jnp.dot(w_ref[layer, t], tapped,          # MXU, f32 acc
                                preferred_element_type=jnp.float32)
        z = acc + b_ref[layer]                                    # (CMAX,1) lane-bcast
        return pl.reciprocal(1.0 + jnp.exp(-z), approx=True)      # sigmoid on EUP

    act = x_ref[0].astype(jnp.float32)        # (CMAX, HW)
    a1 = conv3x3_sigmoid(act, 0)              # ae1 forward
    a2 = conv3x3_sigmoid(a1, 1)               # c0  forward
    a3 = conv3x3_sigmoid(a2, 2)               # c1  forward
    a4 = conv3x3_sigmoid(a3, 3)               # c2  forward
    r3 = conv3x3_sigmoid(a4, 4)               # c2  reconstruct
    r2 = conv3x3_sigmoid(r3, 5)               # c1  reconstruct
    r1 = conv3x3_sigmoid(r2, 6)               # c0  reconstruct
    xr = conv3x3_sigmoid(r1, 7)               # ae1 reconstruct

    a1_ref[0] = a1
    a2_ref[0] = a2
    a3_ref[0] = a3
    a4_ref[0] = a4
    xr_ref[0] = xr


def daes_fused_forward(x_flat, w_all, b_all, *, H, W):
    """x_flat: (N, CMAX, H*W) bf16, w_all: (L,9,CMAX,CMAX) bf16, b_all: (L,CMAX,1) f32.
    Returns 5 arrays (a1, a2, a3, a4, xr), each (N, CMAX, H*W) f32."""
    N, cmax, HW = x_flat.shape
    assert HW == H * W
    # TODO(synk): pad + mask the lane axis for H*W not divisible by 128.
    assert HW % 128 == 0 and cmax % 8 == 0, "need lane-dense (8,128) tiles"

    roll_sign = -1 if _roll_matches_jnp_roll() else 1
    kernel = partial(_daes_fused_kernel, H=H, W=W, roll_sign=roll_sign)

    act_block = pl.BlockSpec((1, cmax, HW), lambda n: (n, 0, 0))
    out_sds = jax.ShapeDtypeStruct((N, cmax, HW), jnp.float32)

    return pl.pallas_call(
        kernel,
        out_shape=(out_sds,) * 5,
        grid_spec=pltpu.PrefetchScalarGridSpec(
            num_scalar_prefetch=0,
            grid=(N,),
            in_specs=[
                act_block,                                          # input image
                pl.BlockSpec(w_all.shape, lambda n: (0, 0, 0, 0)),  # weights resident
                pl.BlockSpec(b_all.shape, lambda n: (0, 0, 0)),     # biases resident
            ],
            out_specs=(act_block,) * 5,
        ),
        compiler_params=pltpu.CompilerParams(
            dimension_semantics=("parallel",)),   # images across TensorCores
    )(x_flat, w_all, b_all)


# ----------------------------- parameter packing -----------------------------

def _conv_weight_to_taps(w, cmax):
    """Conv2d weight (cout, cin, 3, 3) -> (9, cmax, cmax): zero-padded channels,
    tap-major with tap = kh*3 + kw and per-tap layout [cout, cin]."""
    cout, cin = w.shape[:2]
    w_pad = jnp.zeros((cmax, cmax, KSIZE, KSIZE), jnp.float32)
    w_pad = w_pad.at[:cout, :cin].set(w.astype(jnp.float32))
    return jnp.transpose(w_pad, (2, 3, 0, 1)).reshape(KSIZE * KSIZE, cmax, cmax)


def _convtranspose_as_conv(w_t):
    """ConvTranspose2d weight (cin_t, cout_t, 3, 3) with stride=1, pad=1 is a
    regular 'same' conv with spatially flipped kernel and swapped channel axes."""
    return jnp.transpose(jnp.flip(w_t, axis=(2, 3)), (1, 0, 2, 3))


def pack_daes_params(params):
    layer_ws = [
        params['ae1']['fw_w'], params['c0']['fw_w'],
        params['c1']['fw_w'], params['c2']['fw_w'],
        _convtranspose_as_conv(params['c2']['bw_w']),
        _convtranspose_as_conv(params['c1']['bw_w']),
        _convtranspose_as_conv(params['c0']['bw_w']),
        _convtranspose_as_conv(params['ae1']['bw_w']),
    ]
    layer_bs = [
        params['ae1']['fw_b'], params['c0']['fw_b'],
        params['c1']['fw_b'], params['c2']['fw_b'],
        params['c2']['bw_b'], params['c1']['bw_b'],
        params['c0']['bw_b'], params['ae1']['bw_b'],
    ]
    w_all = jnp.stack([_conv_weight_to_taps(w, CMAX) for w in layer_ws])
    b_all = jnp.stack([jnp.pad(b.astype(jnp.float32), (0, CMAX - b.shape[0]))
                       for b in layer_bs])[..., None]
    return w_all.astype(jnp.bfloat16), b_all           # (8,9,8,8) bf16, (8,8,1) f32


def _uniform(key, shape, bound):
    return jax.random.uniform(key, shape, jnp.float32, -bound, bound)


def make_dae_params(key, layer_config):
    k, cin, cout, stride, pad = layer_config
    assert k == 3 and stride == 1 and pad == 1, "kernel handles k=3, stride=1, pad=1"
    keys = jax.random.split(key, 4)
    bound_f = 1.0 / math.sqrt(cin * k * k)
    bound_b = 1.0 / math.sqrt(cout * k * k)
    return dict(
        fw_w=_uniform(keys[0], (cout, cin, k, k), bound_f),   # Conv2d weight
        fw_b=_uniform(keys[1], (cout,), bound_f),             # Conv2d bias
        bw_w=_uniform(keys[2], (cout, cin, k, k), bound_b),   # ConvTranspose2d weight
        bw_b=_uniform(keys[3], (cin,), bound_b),              # ConvTranspose2d bias
    )


# ------------------------------- DAEs forward --------------------------------

def daes_forward_eval(params, x, noise_key, img_info):
    """DAEs.forward in eval mode: returns (a1, a2, a3, a4, x_reconstruct)."""
    N, cin, H, W = x.shape
    if img_info['img_type'] == 'opt':
        x = x + jax.random.normal(noise_key, x.shape, x.dtype) * 0.06   # add_GaussianNoise
    else:
        # TODO(synk): 'sar' gamma-noise path (torch.distributions.Gamma) not implemented.
        pass

    w_all, b_all = pack_daes_params(params)
    # NCHW -> (N, CMAX, H*W): channel zero-pad + free reshape (no transposes).
    x_flat = jnp.pad(x, ((0, 0), (0, CMAX - cin), (0, 0), (0, 0)))
    x_flat = x_flat.reshape(N, CMAX, H * W).astype(jnp.bfloat16)

    a1, a2, a3, a4, xr = daes_fused_forward(x_flat, w_all, b_all, H=H, W=W)

    cout = params['ae1']['fw_w'].shape[0]
    to_nchw = lambda a, c: a[:, :c, :].reshape(N, c, H, W)
    # TODO(synk): training-mode branch (per-DAE MSE loss + Adam step inside forward)
    # is an optimizer update, not a pure forward pass; not implemented as a kernel.
    return (to_nchw(a1, cout), to_nchw(a2, cout),
            to_nchw(a3, cout), to_nchw(a4, cout), to_nchw(xr, cin))


if __name__ == "__main__":
    key = jax.random.PRNGKey(0)
    k_x, k_noise, k_p = jax.random.split(key, 3)

    img_info = {'img_type': 'opt'}
    architecture_config = {
        'conv_config': [[3, 4, 8, 1, 1]],                       # [k, Cin, Cout, stride, pad]
        'coupling_config': [[3, 8, 8, 1, 1],
                            [3, 8, 8, 1, 1],
                            [3, 8, 8, 1, 1]],
    }

    pkeys = jax.random.split(k_p, 4)
    params = {
        'ae1': make_dae_params(pkeys[0], architecture_config['conv_config'][0]),
        'c0': make_dae_params(pkeys[1], architecture_config['coupling_config'][0]),
        'c1': make_dae_params(pkeys[2], architecture_config['coupling_config'][1]),
        'c2': make_dae_params(pkeys[3], architecture_config['coupling_config'][2]),
    }

    x = jax.random.normal(k_x, (2, 4, 16, 16), jnp.float32)     # NCHW, like PyTorch

    outs = jax.block_until_ready(daes_forward_eval(params, x, k_noise, img_info))
    a1, a2, a3, a4, xr = outs

    assert a1.shape == (2, 8, 16, 16)
    assert a2.shape == (2, 8, 16, 16)
    assert a3.shape == (2, 8, 16, 16)
    assert a4.shape == (2, 8, 16, 16)
    assert xr.shape == (2, 4, 16, 16)
    assert all(bool(jnp.all(jnp.isfinite(o))) for o in outs)
    print("KERNEL_OK")
</pallas_src>

<mosaic_0001>
module attributes {stable_mosaic.version = 11 : i64} {
  func.func @probe_kernel(%arg0: memref<8x128xf32, #tpu.memory_space<vmem>>, %arg1: memref<8x128xf32, #tpu.memory_space<vmem>>) attributes {dimension_semantics = [], scalar_prefetch = 0 : i64, scratch_operands = 0 : i64, tpu.core_type = #tpu.core_type<tc>} {
    %c0 = arith.constant 0 : index
    %c0_0 = arith.constant 0 : index
    %0 = vector.load %arg0[%c0, %c0_0] : memref<8x128xf32, #tpu.memory_space<vmem>>, vector<8x128xf32>
    %c1_i32 = arith.constant 1 : i32
    %1 = tpu.dynamic_rotate %0 by %c1_i32 dim 1 : vector<8x128xf32>, i32 -> vector<8x128xf32>
    %c0_1 = arith.constant 0 : index
    %c0_2 = arith.constant 0 : index
    %2 = vector.load %arg1[%c0_1, %c0_2] : memref<8x128xf32, #tpu.memory_space<vmem>>, vector<8x128xf32>
    tpu.vector_store %arg1[%c0_1, %c0_2], %1 {strides = array<i32>} : memref<8x128xf32, #tpu.memory_space<vmem>>, vector<8x128xf32>,
    return
  }
}

</mosaic_0001>

<bundles_post_ra>
// kernel: tpu_custom_call.1
= control target key start
LH: loop header
LB: loop body
LE: loop exit
PB: predicated region body
PF: predicated region fallthrough
CT: control target
= control target key end

     0   :  { %6 = vsyncpa [#allocation3], 0  ;;  %s106_s0 = inlined_call_operand.hbm [shape: f32[8,128], index: 0, kind: input, shape index: {}]   ;;  %s107_s1 = inlined_call_operand.hbm [shape: f32[8,128], index: 1, kind: output, shape index: {}]  }
   0x1   :  { %7 = vsyncpa [#allocation4], 0  ;;  %s87_s6 = smov [#allocation2]  }
   0x2   :  { %s14_s7 = sshll.u32 %s87_s6, 4  ;;  %s15_s7 = int_to_ptr.vmem [resolvable:$true] %s14_s7 }
   0x3   :  { %s51_s8 = scalar_lea.vmem %s15_s7, 128  ;;  %p56_p1 = scmp.lt.s32.totalorder %s15_s7, %s15_s7 }
   0x4   :  { %p52_p0 = scmp.ne.s32.totalorder %s15_s7, %s51_s8  ;;  %p57_p2 = scmp.lt.s32.totalorder %s51_s8, %s51_s8 }
   0x6   :  { %p58_p3 = por %p57_p2, %p56_p1 }
   0x8   :  { %p59_p4 = pnand %p58_p3, %p52_p0 }
   0xa   :  { %62 = shalt.err (!%p59_p4)
}
   0xb   :  { %17 = dma.hbm_to_vmem [thread:$0]  %s106_s0, 128, %s15_s7, [#allocation3]  }
   0xc   :  { %83 = dma.done.wait [#allocation3], 128  }
   0xd   :  { %84 = vsyncadd [#allocation3], 4294967168  ;;  %v21_v0 = vld [vmem:[#allocation2] sm:$0xff]  ;;  %s88_s11 = smov 1   ;;  %s89_s12 = smov [#allocation5]  }
   0xe   :  { %22 = vrot.lane.b32.xlu0 %v21_v0, %s88_s11  ;;  %s31_s13 = sshll.u32 %s89_s12, 4  ;;  %s32_s13 = int_to_ptr.vmem [resolvable:$true] %s31_s13 }
   0xf   :  { %s63_s14 = scalar_lea.vmem %s32_s13, 128  ;;  %p68_p6 = scmp.lt.s32.totalorder %s32_s13, %s32_s13 }
  0x10   :  { %p64_p5 = scmp.ne.s32.totalorder %s32_s13, %s63_s14  ;;  %p69_p7 = scmp.lt.s32.totalorder %s63_s14, %s63_s14 }
  0x12   :  { %p70_p8 = por %p69_p7, %p68_p6 }
  0x14   :  { %p71_p9 = pnand %p70_p8, %p64_p5 }
  0x80   :  { %v23_v1 = vpop.permute.xlu0 %22 }
  0x81   :  { %24 = vst [vmem:[#allocation5] sm:$0xff] %v23_v1 }
  0x82   :  { %74 = shalt.err (!%p71_p9)
}
  0x83   :  { %34 = dma.vmem_to_hbm [thread:$0]  %s32_s13, 128, %s107_s1, [#allocation4]  }
  0x84   :  { %85 = dma.done.wait [#allocation4], 128  }
  0x85   :  { %86 = vsyncadd [#allocation4], 4294967168 }
  0x86   :  { %38 = vsyncpa [#allocation3], 1 }
  0x87   :  { %39 = vsyncpa [#allocation4], 1 }

</bundles_post_ra>
